<compile_context>
chip_gen: v7x
topology: tpu7x:2x2x1
jax: 0.10.0
libtpu: 0.0.40
codegen_flags: <defaults>
</compile_context>

<pallas_src>
import functools

import jax
import jax.numpy as jnp
from jax.experimental import pallas as pl
from jax.experimental.pallas import tpu as pltpu


def _largest_divisor_le(n, cap):
    cap = int(max(1, min(n, cap)))
    for d in range(cap, 0, -1):
        if n % d == 0:
            return d
    return 1


def _codebook_kernel(x_ref, wb_ref, o_ref, *, n_clusters, n_channels,
                     batch_block, row_tile):
    # x_ref : (TB, C, TR, 128) f32 VMEM  (pixels lane-dense, channel on slow axis)
    # wb_ref: (K*C + K,)       f32 SMEM  (w[k,c] = -2*center[k,c] at [k*C+c],
    #                                     b[k]   = ||center_k||^2 at [K*C+k])
    # o_ref : (TB, TR, 128)    i32 VMEM  (lane-dense output)
    K, C = n_clusters, n_channels

    # Row-chunk size: bound vreg live ranges (C channel tiles + s/best_s/best_i)
    # so load-CSE across the K loop cannot spill the 64-vreg file.
    if row_tile % 32 == 0:
        rc = 32
    elif row_tile % 8 == 0:
        rc = 8
    else:
        rc = row_tile          # tiny full-extent tile (e.g. P=2): single chunk
    n_chunks = row_tile // rc

    def argmin_rows(t, r):
        # Hoist the C channel loads once per row-chunk; reused across all K.
        xs = [x_ref[t, c, pl.ds(r, rc), :] for c in range(C)]
        best_s = None
        best_i = None
        for k in range(K):
            b_k = wb_ref[K * C + k]                 # ||center_k||^2 (SMEM scalar)
            s = xs[0] * wb_ref[k * C] + b_k         # w[k,c] = -2*center[k,c]
            for c in range(1, C):
                s = s + xs[c] * wb_ref[k * C + c]
            if best_s is None:
                best_s = s
                best_i = jnp.zeros(s.shape, dtype=jnp.int32)
            else:
                better = s < best_s                 # strict < => first-occurrence ties
                best_i = jnp.where(better, jnp.int32(k), best_i)
                best_s = jnp.minimum(best_s, s)     # min is compare-independent
        o_ref[t, pl.ds(r, rc), :] = best_i

    for t in range(batch_block):                    # static unroll (TB <= 8)
        if n_chunks == 1:
            argmin_rows(t, 0)
        else:
            def body(i, carry):
                argmin_rows(t, pl.multiple_of(i * rc, rc))
                return carry
            jax.lax.fori_loop(0, n_chunks, body, None)


def codebook_forward(x_nchw, cluster_centers, *, rows_per_tile=512):
    """x_nchw: (B, C, H, W) f32; cluster_centers: (1, K, C, 1, 1) f32.

    Returns (B, 1, H, W) int32 nearest-cluster indices.
    """
    B, C, H, W = x_nchw.shape
    K = cluster_centers.shape[1]
    HW = H * W
    LANE = 128

    # Channel-major flatten: pure reshape, no transpose / extra HBM traffic.
    x = x_nchw.reshape(B, C, HW).astype(jnp.float32)

    # -2*x.c + ||c||^2 reformulation (argmin-equivalent): precompute w and b,
    # flatten to 1-D for SMEM residency (avoids 2-D SMEM padding).
    centers = cluster_centers.reshape(K, C).astype(jnp.float32)
    w = -2.0 * centers                               # (K, C)
    b = jnp.sum(centers * centers, axis=1)           # (K,)
    wb = jnp.concatenate([w.reshape(-1), b])         # (K*C + K,)

    P = -(-HW // LANE)                               # lane-rows per image

    # Row-tile target, clamped so the double-buffered footprint stays v7x-safe.
    VMEM_BUDGET = 24 * 1024 * 1024                   # < 32 MiB scoped default everywhere
    bytes_per_row_tb1 = 2 * (C + 1) * LANE * 4       # x + out, double-buffered, TB=1
    tr_cap = max(8, (VMEM_BUDGET // bytes_per_row_tb1) // 8 * 8)
    tr_target = max(8, (rows_per_tile // 8) * 8)
    tr_target = min(tr_target, tr_cap)

    if P <= tr_target:
        TR, Pp = P, P                                # full row extent -> any TR legal
    else:
        TR = tr_target                               # multiple of 8
        Pp = -(-P // TR) * TR                        # pad row count to multiple of TR

    # Batch-block small-HW workloads so each grid step keeps >= ~64K pixels.
    per_batch_bytes = 2 * (C + 1) * TR * LANE * 4
    tb_vmem_cap = max(1, VMEM_BUDGET // per_batch_bytes)
    want = max(1, -(-65536 // (TR * LANE)))
    TB = _largest_divisor_le(B, min(8, tb_vmem_cap, want))
    # Keep >= 2 parallel grid steps when possible (v7x has 2 TensorCores).
    if (B // TB) * (Pp // TR) == 1 and B >= 2:
        TB = _largest_divisor_le(B, B // 2)

    pad = Pp * LANE - HW
    if pad:
        # TODO(synk): handle the ragged pixel tail in-kernel (masked last block)
        # to avoid this extra HBM round-trip when HW % 128 != 0.
        x = jnp.pad(x, ((0, 0), (0, 0), (0, pad)))
    x = x.reshape(B, C, Pp, LANE)

    kernel = functools.partial(_codebook_kernel, n_clusters=K, n_channels=C,
                               batch_block=TB, row_tile=TR)

    out = pl.pallas_call(
        kernel,
        out_shape=jax.ShapeDtypeStruct((B, Pp, LANE), jnp.int32),
        grid_spec=pltpu.PrefetchScalarGridSpec(
            num_scalar_prefetch=0,
            grid=(B // TB, Pp // TR),
            in_specs=[
                # pixel tile: lane-dense (TR, 128) per channel, TB images per step
                pl.BlockSpec((TB, C, TR, LANE), lambda i, p: (i, 0, p, 0)),
                # flattened codebook (w | b) resident in SMEM (scalar access)
                pl.BlockSpec(memory_space=pltpu.MemorySpace.SMEM),
            ],
            out_specs=pl.BlockSpec((TB, TR, LANE), lambda i, p: (i, p, 0)),
        ),
        compiler_params=pltpu.CompilerParams(
            dimension_semantics=("parallel", "parallel")),
    )(x, wb)

    # (B, Pp, 128) -> (B, HW) -> (B, 1, H, W): reshapes/slice only, no transpose.
    out = out.reshape(B, Pp * LANE)[:, :HW].reshape(B, 1, H, W)
    return out


def _reference(x_nchw, cluster_centers):
    # Pure-JAX mirror of the PyTorch forward (for verification).
    d = jnp.sum(jnp.square(x_nchw[:, None] - cluster_centers), axis=2)  # (B, K, H, W)
    return jnp.argmin(d, axis=1, keepdims=True).astype(jnp.int32)


if __name__ == "__main__":
    key = jax.random.PRNGKey(0)
    kx, kc = jax.random.split(key)

    B, C, H, W = 2, 4, 16, 16
    K = 8  # n_clusters

    x = jax.random.normal(kx, (B, C, H, W), dtype=jnp.float32)
    # Deterministic synthetic "kmeans" centers (module __init__ uses zeros, which
    # would make argmin trivially 0; use a seeded init instead).
    cluster_centers = jax.random.normal(kc, (1, K, C, 1, 1), dtype=jnp.float32)

    out = codebook_forward(x, cluster_centers)
    out = jax.block_until_ready(out)

    ref = _reference(x, cluster_centers)
    assert out.shape == (B, 1, H, W), out.shape
    assert out.dtype == jnp.int32

    if not bool(jnp.all(out == ref)):
        # Any disagreement must be a floating-point near-tie between the two
        # argmin-equivalent formulations ((x-c)^2 sum vs -2*x.c + ||c||^2),
        # not a real error: verify via the actual squared distances.
        d = jnp.sum(jnp.square(x[:, None] - cluster_centers), axis=2)  # (B, K, H, W)
        d_out = jnp.take_along_axis(d, out, axis=1)
        d_ref = jnp.take_along_axis(d, ref, axis=1)
        assert bool(jnp.all(jnp.abs(d_out - d_ref) <= 1e-4)), "mismatch vs reference"

    print("KERNEL_OK")
</pallas_src>

<mosaic_0001>
module attributes {stable_mosaic.version = 11 : i64} {
  func.func @_codebook_kernel(%arg0: i32, %arg1: i32, %arg2: memref<1x4x2x128xf32, #tpu.memory_space<vmem>>, %arg3: memref<40xf32, #tpu.memory_space<smem>>, %arg4: memref<1x2x128xi32, #tpu.memory_space<vmem>>) attributes {dimension_semantics = [#tpu.dimension_semantics<parallel>, #tpu.dimension_semantics<parallel>], iteration_bounds = array<i64: 2, 1>, scalar_prefetch = 0 : i64, scratch_operands = 0 : i64, tpu.core_type = #tpu.core_type<tc>, window_params = [{transform_indices = @transform_0, window_bounds = array<i64: 1, 4, 2, 128>}, {transform_indices = @transform_1, window_bounds = array<i64: 40>}, {transform_indices = @transform_2, window_bounds = array<i64: 1, 2, 128>}]} {
    %c0 = arith.constant 0 : index
    %c0_0 = arith.constant 0 : index
    %c0_1 = arith.constant 0 : index
    %c0_2 = arith.constant 0 : index
    %0 = vector.load %arg2[%c0, %c0_0, %c0_1, %c0_2] : memref<1x4x2x128xf32, #tpu.memory_space<vmem>>, vector<1x1x2x128xf32>
    %1 = vector.shape_cast %0 : vector<1x1x2x128xf32> to vector<2x128xf32>
    %c0_3 = arith.constant 0 : index
    %c1 = arith.constant 1 : index
    %c0_4 = arith.constant 0 : index
    %c0_5 = arith.constant 0 : index
    %2 = vector.load %arg2[%c0_3, %c1, %c0_4, %c0_5] : memref<1x4x2x128xf32, #tpu.memory_space<vmem>>, vector<1x1x2x128xf32>
    %3 = vector.shape_cast %2 : vector<1x1x2x128xf32> to vector<2x128xf32>
    %c0_6 = arith.constant 0 : index
    %c2 = arith.constant 2 : index
    %c0_7 = arith.constant 0 : index
    %c0_8 = arith.constant 0 : index
    %4 = vector.load %arg2[%c0_6, %c2, %c0_7, %c0_8] : memref<1x4x2x128xf32, #tpu.memory_space<vmem>>, vector<1x1x2x128xf32>
    %5 = vector.shape_cast %4 : vector<1x1x2x128xf32> to vector<2x128xf32>
    %c0_9 = arith.constant 0 : index
    %c3 = arith.constant 3 : index
    %c0_10 = arith.constant 0 : index
    %c0_11 = arith.constant 0 : index
    %6 = vector.load %arg2[%c0_9, %c3, %c0_10, %c0_11] : memref<1x4x2x128xf32, #tpu.memory_space<vmem>>, vector<1x1x2x128xf32>
    %7 = vector.shape_cast %6 : vector<1x1x2x128xf32> to vector<2x128xf32>
    %c32 = arith.constant 32 : index
    %8 = memref.load %arg3[%c32] : memref<40xf32, #tpu.memory_space<smem>>
    %c0_12 = arith.constant 0 : index
    %9 = memref.load %arg3[%c0_12] : memref<40xf32, #tpu.memory_space<smem>>
    %10 = vector.broadcast %9 : f32 to vector<2x128xf32>
    %11 = arith.mulf %1, %10 : vector<2x128xf32>
    %12 = vector.broadcast %8 : f32 to vector<2x128xf32>
    %13 = arith.addf %11, %12 : vector<2x128xf32>
    %c1_13 = arith.constant 1 : index
    %14 = memref.load %arg3[%c1_13] : memref<40xf32, #tpu.memory_space<smem>>
    %15 = vector.broadcast %14 : f32 to vector<2x128xf32>
    %16 = arith.mulf %3, %15 : vector<2x128xf32>
    %17 = arith.addf %13, %16 : vector<2x128xf32>
    %c2_14 = arith.constant 2 : index
    %18 = memref.load %arg3[%c2_14] : memref<40xf32, #tpu.memory_space<smem>>
    %19 = vector.broadcast %18 : f32 to vector<2x128xf32>
    %20 = arith.mulf %5, %19 : vector<2x128xf32>
    %21 = arith.addf %17, %20 : vector<2x128xf32>
    %c3_15 = arith.constant 3 : index
    %22 = memref.load %arg3[%c3_15] : memref<40xf32, #tpu.memory_space<smem>>
    %23 = vector.broadcast %22 : f32 to vector<2x128xf32>
    %24 = arith.mulf %7, %23 : vector<2x128xf32>
    %25 = arith.addf %21, %24 : vector<2x128xf32>
    %c0_i32 = arith.constant 0 : i32
    %26 = vector.broadcast %c0_i32 : i32 to vector<2x128xi32>
    %c33 = arith.constant 33 : index
    %27 = memref.load %arg3[%c33] : memref<40xf32, #tpu.memory_space<smem>>
    %c4 = arith.constant 4 : index
    %28 = memref.load %arg3[%c4] : memref<40xf32, #tpu.memory_space<smem>>
    %29 = vector.broadcast %28 : f32 to vector<2x128xf32>
    %30 = arith.mulf %1, %29 : vector<2x128xf32>
    %31 = vector.broadcast %27 : f32 to vector<2x128xf32>
    %32 = arith.addf %30, %31 : vector<2x128xf32>
    %c5 = arith.constant 5 : index
    %33 = memref.load %arg3[%c5] : memref<40xf32, #tpu.memory_space<smem>>
    %34 = vector.broadcast %33 : f32 to vector<2x128xf32>
    %35 = arith.mulf %3, %34 : vector<2x128xf32>
    %36 = arith.addf %32, %35 : vector<2x128xf32>
    %c6 = arith.constant 6 : index
    %37 = memref.load %arg3[%c6] : memref<40xf32, #tpu.memory_space<smem>>
    %38 = vector.broadcast %37 : f32 to vector<2x128xf32>
    %39 = arith.mulf %5, %38 : vector<2x128xf32>
    %40 = arith.addf %36, %39 : vector<2x128xf32>
    %c7 = arith.constant 7 : index
    %41 = memref.load %arg3[%c7] : memref<40xf32, #tpu.memory_space<smem>>
    %42 = vector.broadcast %41 : f32 to vector<2x128xf32>
    %43 = arith.mulf %7, %42 : vector<2x128xf32>
    %44 = arith.addf %40, %43 : vector<2x128xf32>
    %45 = arith.cmpf olt, %44, %25 : vector<2x128xf32>
    %c1_i32 = arith.constant 1 : i32
    %46 = vector.broadcast %c1_i32 : i32 to vector<2x128xi32>
    %47 = arith.select %45, %46, %26 : vector<2x128xi1>, vector<2x128xi32>
    %48 = arith.minimumf %25, %44 : vector<2x128xf32>
    %c34 = arith.constant 34 : index
    %49 = memref.load %arg3[%c34] : memref<40xf32, #tpu.memory_space<smem>>
    %c8 = arith.constant 8 : index
    %50 = memref.load %arg3[%c8] : memref<40xf32, #tpu.memory_space<smem>>
    %51 = vector.broadcast %50 : f32 to vector<2x128xf32>
    %52 = arith.mulf %1, %51 : vector<2x128xf32>
    %53 = vector.broadcast %49 : f32 to vector<2x128xf32>
    %54 = arith.addf %52, %53 : vector<2x128xf32>
    %c9 = arith.constant 9 : index
    %55 = memref.load %arg3[%c9] : memref<40xf32, #tpu.memory_space<smem>>
    %56 = vector.broadcast %55 : f32 to vector<2x128xf32>
    %57 = arith.mulf %3, %56 : vector<2x128xf32>
    %58 = arith.addf %54, %57 : vector<2x128xf32>
    %c10 = arith.constant 10 : index
    %59 = memref.load %arg3[%c10] : memref<40xf32, #tpu.memory_space<smem>>
    %60 = vector.broadcast %59 : f32 to vector<2x128xf32>
    %61 = arith.mulf %5, %60 : vector<2x128xf32>
    %62 = arith.addf %58, %61 : vector<2x128xf32>
    %c11 = arith.constant 11 : index
    %63 = memref.load %arg3[%c11] : memref<40xf32, #tpu.memory_space<smem>>
    %64 = vector.broadcast %63 : f32 to vector<2x128xf32>
    %65 = arith.mulf %7, %64 : vector<2x128xf32>
    %66 = arith.addf %62, %65 : vector<2x128xf32>
    %67 = arith.cmpf olt, %66, %48 : vector<2x128xf32>
    %c2_i32 = arith.constant 2 : i32
    %68 = vector.broadcast %c2_i32 : i32 to vector<2x128xi32>
    %69 = arith.select %67, %68, %47 : vector<2x128xi1>, vector<2x128xi32>
    %70 = arith.minimumf %48, %66 : vector<2x128xf32>
    %c35 = arith.constant 35 : index
    %71 = memref.load %arg3[%c35] : memref<40xf32, #tpu.memory_space<smem>>
    %c12 = arith.constant 12 : index
    %72 = memref.load %arg3[%c12] : memref<40xf32, #tpu.memory_space<smem>>
    %73 = vector.broadcast %72 : f32 to vector<2x128xf32>
    %74 = arith.mulf %1, %73 : vector<2x128xf32>
    %75 = vector.broadcast %71 : f32 to vector<2x128xf32>
    %76 = arith.addf %74, %75 : vector<2x128xf32>
    %c13 = arith.constant 13 : index
    %77 = memref.load %arg3[%c13] : memref<40xf32, #tpu.memory_space<smem>>
    %78 = vector.broadcast %77 : f32 to vector<2x128xf32>
    %79 = arith.mulf %3, %78 : vector<2x128xf32>
    %80 = arith.addf %76, %79 : vector<2x128xf32>
    %c14 = arith.constant 14 : index
    %81 = memref.load %arg3[%c14] : memref<40xf32, #tpu.memory_space<smem>>
    %82 = vector.broadcast %81 : f32 to vector<2x128xf32>
    %83 = arith.mulf %5, %82 : vector<2x128xf32>
    %84 = arith.addf %80, %83 : vector<2x128xf32>
    %c15 = arith.constant 15 : index
    %85 = memref.load %arg3[%c15] : memref<40xf32, #tpu.memory_space<smem>>
    %86 = vector.broadcast %85 : f32 to vector<2x128xf32>
    %87 = arith.mulf %7, %86 : vector<2x128xf32>
    %88 = arith.addf %84, %87 : vector<2x128xf32>
    %89 = arith.cmpf olt, %88, %70 : vector<2x128xf32>
    %c3_i32 = arith.constant 3 : i32
    %90 = vector.broadcast %c3_i32 : i32 to vector<2x128xi32>
    %91 = arith.select %89, %90, %69 : vector<2x128xi1>, vector<2x128xi32>
    %92 = arith.minimumf %70, %88 : vector<2x128xf32>
    %c36 = arith.constant 36 : index
    %93 = memref.load %arg3[%c36] : memref<40xf32, #tpu.memory_space<smem>>
    %c16 = arith.constant 16 : index
    %94 = memref.load %arg3[%c16] : memref<40xf32, #tpu.memory_space<smem>>
    %95 = vector.broadcast %94 : f32 to vector<2x128xf32>
    %96 = arith.mulf %1, %95 : vector<2x128xf32>
    %97 = vector.broadcast %93 : f32 to vector<2x128xf32>
    %98 = arith.addf %96, %97 : vector<2x128xf32>
    %c17 = arith.constant 17 : index
    %99 = memref.load %arg3[%c17] : memref<40xf32, #tpu.memory_space<smem>>
    %100 = vector.broadcast %99 : f32 to vector<2x128xf32>
    %101 = arith.mulf %3, %100 : vector<2x128xf32>
    %102 = arith.addf %98, %101 : vector<2x128xf32>
    %c18 = arith.constant 18 : index
    %103 = memref.load %arg3[%c18] : memref<40xf32, #tpu.memory_space<smem>>
    %104 = vector.broadcast %103 : f32 to vector<2x128xf32>
    %105 = arith.mulf %5, %104 : vector<2x128xf32>
    %106 = arith.addf %102, %105 : vector<2x128xf32>
    %c19 = arith.constant 19 : index
    %107 = memref.load %arg3[%c19] : memref<40xf32, #tpu.memory_space<smem>>
    %108 = vector.broadcast %107 : f32 to vector<2x128xf32>
    %109 = arith.mulf %7, %108 : vector<2x128xf32>
    %110 = arith.addf %106, %109 : vector<2x128xf32>
    %111 = arith.cmpf olt, %110, %92 : vector<2x128xf32>
    %c4_i32 = arith.constant 4 : i32
    %112 = vector.broadcast %c4_i32 : i32 to vector<2x128xi32>
    %113 = arith.select %111, %112, %91 : vector<2x128xi1>, vector<2x128xi32>
    %114 = arith.minimumf %92, %110 : vector<2x128xf32>
    %c37 = arith.constant 37 : index
    %115 = memref.load %arg3[%c37] : memref<40xf32, #tpu.memory_space<smem>>
    %c20 = arith.constant 20 : index
    %116 = memref.load %arg3[%c20] : memref<40xf32, #tpu.memory_space<smem>>
    %117 = vector.broadcast %116 : f32 to vector<2x128xf32>
    %118 = arith.mulf %1, %117 : vector<2x128xf32>
    %119 = vector.broadcast %115 : f32 to vector<2x128xf32>
    %120 = arith.addf %118, %119 : vector<2x128xf32>
    %c21 = arith.constant 21 : index
    %121 = memref.load %arg3[%c21] : memref<40xf32, #tpu.memory_space<smem>>
    %122 = vector.broadcast %121 : f32 to vector<2x128xf32>
    %123 = arith.mulf %3, %122 : vector<2x128xf32>
    %124 = arith.addf %120, %123 : vector<2x128xf32>
    %c22 = arith.constant 22 : index
    %125 = memref.load %arg3[%c22] : memref<40xf32, #tpu.memory_space<smem>>
    %126 = vector.broadcast %125 : f32 to vector<2x128xf32>
    %127 = arith.mulf %5, %126 : vector<2x128xf32>
    %128 = arith.addf %124, %127 : vector<2x128xf32>
    %c23 = arith.constant 23 : index
    %129 = memref.load %arg3[%c23] : memref<40xf32, #tpu.memory_space<smem>>
    %130 = vector.broadcast %129 : f32 to vector<2x128xf32>
    %131 = arith.mulf %7, %130 : vector<2x128xf32>
    %132 = arith.addf %128, %131 : vector<2x128xf32>
    %133 = arith.cmpf olt, %132, %114 : vector<2x128xf32>
    %c5_i32 = arith.constant 5 : i32
    %134 = vector.broadcast %c5_i32 : i32 to vector<2x128xi32>
    %135 = arith.select %133, %134, %113 : vector<2x128xi1>, vector<2x128xi32>
    %136 = arith.minimumf %114, %132 : vector<2x128xf32>
    %c38 = arith.constant 38 : index
    %137 = memref.load %arg3[%c38] : memref<40xf32, #tpu.memory_space<smem>>
    %c24 = arith.constant 24 : index
    %138 = memref.load %arg3[%c24] : memref<40xf32, #tpu.memory_space<smem>>
    %139 = vector.broadcast %138 : f32 to vector<2x128xf32>
    %140 = arith.mulf %1, %139 : vector<2x128xf32>
    %141 = vector.broadcast %137 : f32 to vector<2x128xf32>
    %142 = arith.addf %140, %141 : vector<2x128xf32>
    %c25 = arith.constant 25 : index
    %143 = memref.load %arg3[%c25] : memref<40xf32, #tpu.memory_space<smem>>
    %144 = vector.broadcast %143 : f32 to vector<2x128xf32>
    %145 = arith.mulf %3, %144 : vector<2x128xf32>
    %146 = arith.addf %142, %145 : vector<2x128xf32>
    %c26 = arith.constant 26 : index
    %147 = memref.load %arg3[%c26] : memref<40xf32, #tpu.memory_space<smem>>
    %148 = vector.broadcast %147 : f32 to vector<2x128xf32>
    %149 = arith.mulf %5, %148 : vector<2x128xf32>
    %150 = arith.addf %146, %149 : vector<2x128xf32>
    %c27 = arith.constant 27 : index
    %151 = memref.load %arg3[%c27] : memref<40xf32, #tpu.memory_space<smem>>
    %152 = vector.broadcast %151 : f32 to vector<2x128xf32>
    %153 = arith.mulf %7, %152 : vector<2x128xf32>
    %154 = arith.addf %150, %153 : vector<2x128xf32>
    %155 = arith.cmpf olt, %154, %136 : vector<2x128xf32>
    %c6_i32 = arith.constant 6 : i32
    %156 = vector.broadcast %c6_i32 : i32 to vector<2x128xi32>
    %157 = arith.select %155, %156, %135 : vector<2x128xi1>, vector<2x128xi32>
    %158 = arith.minimumf %136, %154 : vector<2x128xf32>
    %c39 = arith.constant 39 : index
    %159 = memref.load %arg3[%c39] : memref<40xf32, #tpu.memory_space<smem>>
    %c28 = arith.constant 28 : index
    %160 = memref.load %arg3[%c28] : memref<40xf32, #tpu.memory_space<smem>>
    %161 = vector.broadcast %160 : f32 to vector<2x128xf32>
    %162 = arith.mulf %1, %161 : vector<2x128xf32>
    %163 = vector.broadcast %159 : f32 to vector<2x128xf32>
    %164 = arith.addf %162, %163 : vector<2x128xf32>
    %c29 = arith.constant 29 : index
    %165 = memref.load %arg3[%c29] : memref<40xf32, #tpu.memory_space<smem>>
    %166 = vector.broadcast %165 : f32 to vector<2x128xf32>
    %167 = arith.mulf %3, %166 : vector<2x128xf32>
    %168 = arith.addf %164, %167 : vector<2x128xf32>
    %c30 = arith.constant 30 : index
    %169 = memref.load %arg3[%c30] : memref<40xf32, #tpu.memory_space<smem>>
    %170 = vector.broadcast %169 : f32 to vector<2x128xf32>
    %171 = arith.mulf %5, %170 : vector<2x128xf32>
    %172 = arith.addf %168, %171 : vector<2x128xf32>
    %c31 = arith.constant 31 : index
    %173 = memref.load %arg3[%c31] : memref<40xf32, #tpu.memory_space<smem>>
    %174 = vector.broadcast %173 : f32 to vector<2x128xf32>
    %175 = arith.mulf %7, %174 : vector<2x128xf32>
    %176 = arith.addf %172, %175 : vector<2x128xf32>
    %177 = arith.cmpf olt, %176, %158 : vector<2x128xf32>
    %c7_i32 = arith.constant 7 : i32
    %178 = vector.broadcast %c7_i32 : i32 to vector<2x128xi32>
    %179 = arith.select %177, %178, %157 : vector<2x128xi1>, vector<2x128xi32>
    %c0_16 = arith.constant 0 : index
    %c0_17 = arith.constant 0 : index
    %c0_18 = arith.constant 0 : index
    %180 = vector.load %arg4[%c0_16, %c0_17, %c0_18] : memref<1x2x128xi32, #tpu.memory_space<vmem>>, vector<1x2x128xi32>
    %181 = vector.shape_cast %180 : vector<1x2x128xi32> to vector<2x128xi32>
    %182 = vector.shape_cast %179 : vector<2x128xi32> to vector<1x2x128xi32>
    tpu.vector_store %arg4[%c0_16, %c0_17, %c0_18], %182 {strides = array<i32>} : memref<1x2x128xi32, #tpu.memory_space<vmem>>, vector<1x2x128xi32>,
    return
  }
  func.func @transform_0(%arg0: i32, %arg1: i32) -> (i32, i32, i32, i32) {
    %c0_i32 = arith.constant 0 : i32
    %c0_i32_0 = arith.constant 0 : i32
    %c0_i32_1 = arith.constant 0 : i32
    return %arg0, %c0_i32, %arg1, %c0_i32_0 : i32, i32, i32, i32
  }
  func.func @transform_1(%arg0: i32, %arg1: i32) -> i32 {
    %c0_i32 = arith.constant 0 : i32
    %c0_i32_0 = arith.constant 0 : i32
    return %c0_i32 : i32
  }
  func.func @transform_2(%arg0: i32, %arg1: i32) -> (i32, i32, i32) {
    %c0_i32 = arith.constant 0 : i32
    %c0_i32_0 = arith.constant 0 : i32
    return %arg0, %arg1, %c0_i32 : i32, i32, i32
  }
}

</mosaic_0001>

<bundles_post_ra>
// kernel: tpu_custom_call.1
= control target key start
LH: loop header
LB: loop body
LE: loop exit
PB: predicated region body
PF: predicated region fallthrough
CT: control target
= control target key end

     0   :  { %7 = vsyncpa [#allocation3], 0  ;;  %s1116_s0 = inlined_call_operand.hbm [shape: f32[2,4,2,128], index: 0, kind: input, shape index: {}]   ;;  %s1117_s1 = inlined_call_operand.vmem [shape: f32[40], index: 1, kind: input, shape index: {}]   ;;  %s1118_s2 = inlined_call_operand.hbm [shape: s32[2,2,128], index: 2, kind: output, shape index: {}]  }
   0x1   :  { %9 = vsyncpa [#allocation3 + $0x1], 0 }
   0x2   :  { %10 = vsyncpa [#allocation5], 0 }
   0x3   :  { %11 = vsyncpa [#allocation4], 0 }
   0x4   :  { %13 = vsyncpa [#allocation4 + $0x1], 0  ;;  %s762_s9 = smov 0   ;;  %s764_s10 = smov 0  }
   0x5   :  { %s766_s11 = smov 0   ;;  %s768_s12 = smov 0  }
   0x6   :  { %s770_s13 = smov 0   ;;  %s772_s14 = smov 0  }
   0x7 LB: > { %s473_s15 = sadd.s32 4294967295, %s739_s14   ;;  %s474_s16 = sadd.s32 4294967294, %s739_s14   ;;  %s739_s14 = sphi %s772_s14, %s19_s14   ;;  %s735_s13 = sphi %s770_s13, %s1141_s13   ;;  %s731_s12 = sphi %s768_s12, %s1140_s12   ;;  %s727_s11 = sphi %s766_s11, %s1139_s11   ;;  %s723_s10 = sphi %s764_s10, %s1138_s10   ;;  %s719_s9 = sphi %s762_s9, %s1137_s9  }
   0x8   : > { %s40_s17 = sadd.s32 1, %s727_s11  ;;  %p47_p0 = scmp.ne.s32.totalorder %s727_s11, %s723_s10 }
   0x9   : > { %p48_p1 = scmp.eq.s32.totalorder %s739_s14, 0  ;;  %p53_p2 = scmp.ne.s32.totalorder %s723_s10, %s719_s9 }
   0xa   : > { %p800_p3 = scmp.eq.s32.totalorder %s473_s15, 0  ;;  %p100_p4 = scmp.eq.s32.totalorder %s473_s15, 1 }
   0xb   : > { %p804_p5 = por %p48_p1, %p47_p0  ;;  %p106_p6 = scmp.eq.s32.totalorder %s474_s16, 1 }
   0xc   : > { %s1123_s18 = scalar_select %p800_p3, 1, 0 }
   0xd   : > { %p810_p7 = por %p800_p3, %p53_p2  ;;  %p814_p8 = por %p100_p4, %p47_p0 }
   0xe   : > { %p818_p9 = por %p106_p6, %p53_p2  ;;  %p475_p10 = scmp.ge.s32.totalorder %s739_s14, 1 }
   0xf   : > { %s1125_s20 = scalar_select %p810_p7, 1, 0 }
  0x10   : > { %s1126_s21 = scalar_select %p814_p8, 1, 0 }
  0x11   : > { %s1127_s22 = scalar_select %p818_p9, 1, 0 }
  0x12   : > { %p113_p11 = scmp.lt.s32.totalorder %s739_s14, 3  ;;  %s126_s25 = sshll.u32 %s1117_s1, 4  ;;  %s127_s25 = int_to_ptr.vmem [resolvable:$true] %s126_s25 }
  0x13   : > { %p553_p0 = scmp.lt.s32.totalorder %s739_s14, 2  ;;  %s31_s29 = sadd.s32 1, %s735_s13 }
  0x14   : > { %p827_p12 = pnand %p475_p10, %p113_p11  ;;  %p848_p6 = scmp.ge.s32.totalorder %s31_s29, 2 }
  0x15   : > { %p837_p2 = pnand %p553_p0, %p804_p5  ;;  %s137_s3 = sand.u32 1, %s727_s11  }
  0x16   : > { %p540_p1 = pneg %p827_p12  ;;  %s608_s4 = scalar_lea.vmem %s127_s25, 16 }
  0x17   : > { %p609_p10 = scmp.ne.s32.totalorder %s127_s25, %s608_s4  ;;  %p616_p13 = scmp.lt.s32.totalorder %s127_s25, %s127_s25 }
  0x18   : > { %p843_p4 = pnand %p540_p1, %p800_p3  ;;  %p617_p9 = scmp.lt.s32.totalorder %s608_s4, %s608_s4 }
  0x1a   : > { %p610_p11 = pneg %p843_p4  ;;  %p618_p8 = por %p617_p9, %p616_p13 }
  0x1c   : > { %p611_p5 = pnand %p610_p11, %p609_p10 }
  0x1e   : > { %p612_p0 = pneg %p611_p5 }
  0x20   : > { %p619_p1 = pnand %p618_p8, %p612_p0 }
  0x22   : > { %622 = shalt.err (!%p619_p1)
}
  0x23   : > { %s741_s5 = smov [#allocation6]   ;;  %s1143_s29 = smov (%p848_p6, %s31_s29), 0 }
  0x24   : > { %543 = dma.vmem_to_smem (!%p843_p4), %s127_s25, 16, %s741_s5, [#allocation5]  }
  0x25   : > { %s478_s6 = sshll.u32 %s137_s3, 3  ;;  %s35_s7 = ssub.s32 %s735_s13, %s1143_s29 }
  0x26   : > { %p38_p9 = scmp.eq.s32.totalorder %s35_s7, 0  ;;  %s531_s8 = sshll.u32 %s735_s13, 7 }
  0x27   : > { %s867_s19 = scalar_lea.hbm %s1116_s0, %s531_s8  ;;  %s141_s23 = scalar_lea.vmem [#allocation2], %s478_s6 }
  0x28   : > { %s149_s24 = sshll.u32 %s141_s23, 4  ;;  %s876_s28 = scalar_lea.sflag [#allocation3], %s137_s3  ;;  %s874_s24 = int_to_ptr.vmem [resolvable:$true] %s149_s24 }
  0x29   : > { %s872_s25 = scalar_select %p38_p9, %s727_s11, %s40_s17  }
  0x2a   : > { %s623_s30 = scalar_lea.hbm %s867_s19, 128  ;;  %p625_p13 = pneg %p837_p2 }
  0x2b   : > { %p624_p8 = scmp.ne.s32.totalorder %s867_s19, %s623_s30  ;;  %s628_s6 = scalar_lea.hbm %s1116_s0, 256 }
  0x2c   : > { %p629_p10 = scmp.lt.u32.totalorder %s867_s19, %s1116_s0  ;;  %p630_p11 = scmp.lt.u32.totalorder %s628_s6, %s623_s30 }
  0x2d   : > { %p626_p4 = pnand %p625_p13, %p624_p8  ;;  %p632_p0 = scmp.lt.u32.totalorder %s623_s30, %s867_s19 }
  0x2e   : > { %p631_p5 = por %p630_p11, %p629_p10 }
  0x2f   : > { %p627_p6 = pneg %p626_p4 }
  0x30   : > { %p633_p1 = por %p632_p0, %p631_p5 }
  0x32   : > { %p634_p9 = pnand %p633_p1, %p627_p6 }
  0x34   : > { %637 = shalt.err (!%p634_p9)
}
  0x35   : > { %s638_s17 = scalar_lea.vmem %s874_s24, 128  ;;  %s742_s3 = smov [#allocation2]  }
  0x36   : > { %p639_p8 = scmp.ne.s32.totalorder %s874_s24, %s638_s17  ;;  %s643_s15 = sshll.u32 %s742_s3, 4  ;;  %s644_s15 = int_to_ptr.vmem [resolvable:$false] %s643_s15 }
  0x37   : > { %s645_s16 = scalar_lea.vmem %s644_s15, 256  ;;  %p646_p7 = scmp.lt.s32.totalorder %s874_s24, %s644_s15 }
  0x38   : > { %p641_p4 = pnand %p639_p8, %p625_p13  ;;  %p647_p10 = scmp.lt.s32.totalorder %s645_s16, %s638_s17 }
  0x3a   : > { %p642_p3 = pneg %p641_p4  ;;  %p648_p11 = por %p647_p10, %p646_p7 }
  0x3c   : > { %p649_p5 = pnand %p648_p11, %p642_p3 }
  0x3e   : > { %652 = shalt.err (!%p649_p5)
}
  0x3f   : > { %s743_s23 = smov 32   ;;  %s744_s30 = smov 2  }
  0x40   : > { %547 = dma.hbm_to_vmem [thread:$0]  (!%p837_p2), %s867_s19, 128, %s874_s24, %s876_s28, %s743_s23, %s743_s23, %s744_s30  }
  0x41   : > { %161 = sbr.rel (%p827_p12) target bundleno = 136 (0x88), region = 28  ;;  %s907_s4 = sand.u32 (!%p827_p12), 1, %s723_s10  }
  0x42   : > { %s482_s5 = sshll.u32 (!%p827_p12), %s907_s4, 3  ;;  %s164_s6 = scalar_lea.sflag (!%p827_p12), [#allocation3], %s907_s4 }
  0x43   : > { %s167_s7 = scalar_lea.vmem (!%p827_p12), [#allocation2], %s482_s5  ;;  %p1132_p3 = scmp.ne.s32.totalorder (!%p827_p12), %s1125_s20, 0 }
  0x48   : > { %706 = dma.done.wait (%p1132_p3), %s164_s6, 128  }
  0x49   : > { %708 = vsyncadd (%p1132_p3), %s164_s6, 4294967168  ;;  %p1133_p7 = scmp.ne.s32.totalorder %s1123_s18, 0 }
  0x4b   : > { %710 = dma.done.wait (%p1133_p7), [#allocation5], 16  }
  0x4c   : > { %712 = vsyncadd (%p1133_p7), [#allocation5], 4294967280 }
  0x4d   : > { %176 = sfence }
  0x4e   : > { %s919_s26 = sld [smem:[#allocation6 + $0x20]]  ;;  %s489_s19 = sld [smem:[#allocation6 + $0x1]]  ;;  %v923_v0 = vld [vmem:[%s167_s7] sm:$0x3]  ;;  %v925_v1 = vld [vmem:[%s167_s7 + $0x2] sm:$0x3] }
  0x4f   : > { %s201_s27 = sld [smem:[#allocation6]]  ;;  %s490_s24 = sld [smem:[#allocation6 + $0x2]]  ;;  %v931_v2 = vld [vmem:[%s167_s7 + $0x4] sm:$0x3]  ;;  %v937_v3 = vld [vmem:[%s167_s7 + $0x6] sm:$0x3] }
  0x50   : > { %s491_s28 = sld [smem:[#allocation6 + $0x3]]  ;;  %s921_s8 = sld [smem:[#allocation6 + $0x21]]  ;;  %v745_v60 = vmov 0  }
  0x51   : > { %s493_s20 = sld [smem:[#allocation6 + $0x4]]  ;;  %s494_s17 = sld [smem:[#allocation6 + $0x5]] }
  0x52   : > { %s927_s3 = sld [smem:[#allocation6 + $0x6]]  ;;  %s929_s18 = sld [smem:[#allocation6 + $0x7]] }
  0x53   : > { %s933_s15 = sld [smem:[#allocation6 + $0x22]]  ;;  %s935_s16 = sld [smem:[#allocation6 + $0x8]] }
  0x54   : > { %v204_v5 = vstv %s919_s26  ;;  %s940_s23 = sld [smem:[#allocation6 + $0x9]]  ;;  %s942_s30 = sld [smem:[#allocation6 + $0xa]]  ;;  %v207_v7 = vstv %s489_s19 }
  0x55   : > { %v202_v4 = vstv %s201_s27  ;;  %v211_v8 = vstv %s490_s24  ;;  %s945_s5 = sld [smem:[#allocation6 + $0xb]]  ;;  %v208_v9 = vmul.f32 %v925_v1, %v207_v7  ;;  %s952_s7 = sld [smem:[#allocation6 + $0xc]] }
  0x56   : > { %v203_v6 = vmul.f32 %v202_v4, %v923_v0  ;;  %s947_s6 = sld [smem:[#allocation6 + $0x23]]  ;;  %v212_v10 = vmul.f32 %v931_v2, %v211_v8  ;;  %v215_v11 = vstv %s491_s28  ;;  %v222_v12 = vstv %s921_s8  ;;  %s954_s26 = sld [smem:[#allocation6 + $0xd]] }
  0x57   : > { %v216_v14 = vmul.f32 %v937_v3, %v215_v11  ;;  %v220_v15 = vstv %s493_s20  ;;  %v225_v16 = vstv %s494_s17  ;;  %s957_s27 = sld [smem:[#allocation6 + $0xe]]  ;;  %s959_s19 = sld [smem:[#allocation6 + $0xf]] }
  0x58   : > { %v205_v13 = vadd.f32 %v204_v5, %v203_v6  ;;  %v221_v17 = vmul.f32 %v220_v15, %v923_v0  ;;  %v226_v18 = vmul.f32 %v925_v1, %v225_v16  ;;  %v229_v19 = vstv %s927_s3  ;;  %s965_s24 = sld [smem:[#allocation6 + $0x24]]  ;;  %s967_s28 = sld [smem:[#allocation6 + $0x10]] }
  0x59   : > { %v233_v20 = vstv %s929_s18  ;;  %v230_v22 = vmul.f32 %v931_v2, %v229_v19  ;;  %v241_v24 = vstv %s935_s16  ;;  %s972_s8 = sld [smem:[#allocation6 + $0x11]]  ;;  %s974_s20 = sld [smem:[#allocation6 + $0x12]]  ;;  %v243_v27 = vstv %s933_s15 }
  0x5a   : > { %v209_v21 = vadd.f32 %v208_v9, %v205_v13  ;;  %v234_v23 = vmul.f32 %v937_v3, %v233_v20  ;;  %v223_v25 = vadd.f32 %v222_v12, %v221_v17  ;;  %v242_v26 = vmul.f32 %v241_v24, %v923_v0  ;;  %s984_s17 = sld [smem:[#allocation6 + $0x13]]  ;;  %s989_s3 = sld [smem:[#allocation6 + $0x14]] }
  0x5b   : > { %v246_v28 = vstv %s940_s23  ;;  %v250_v31 = vstv %s942_s30  ;;  %v254_v32 = vstv %s945_s5  ;;  %v262_v38 = vstv %s952_s7  ;;  %s993_s18 = sld [smem:[#allocation6 + $0x25]]  ;;  %s1001_s16 = sld [smem:[#allocation6 + $0x16]] }
  0x5c   : > { %v213_v29 = vadd.f32 %v212_v10, %v209_v21  ;;  %v247_v30 = vmul.f32 %v925_v1, %v246_v28  ;;  %v227_v33 = vadd.f32 %v226_v18, %v223_v25  ;;  %v244_v34 = vadd.f32 %v243_v27, %v242_v26  ;;  %s995_s15 = sld [smem:[#allocation6 + $0x15]]  ;;  %s1003_s23 = sld [smem:[#allocation6 + $0x17]] }
  0x5d   : > { %v251_v35 = vmul.f32 %v931_v2, %v250_v31  ;;  %v255_v36 = vmul.f32 %v937_v3, %v254_v32  ;;  %v264_v39 = vstv %s947_s6  ;;  %v267_v40 = vstv %s954_s26  ;;  %s1010_s30 = sld [smem:[#allocation6 + $0x18]]  ;;  %s1012_s5 = sld [smem:[#allocation6 + $0x26]] }
  0x5e   : > { %v217_v37 = vadd.f32 %v216_v14, %v213_v29  ;;  %v231_v41 = vadd.f32 %v230_v22, %v227_v33  ;;  %v248_v42 = vadd.f32 %v247_v30, %v244_v34  ;;  %v263_v43 = vmul.f32 %v262_v38, %v923_v0  ;;  %s1014_s6 = sld [smem:[#allocation6 + $0x19]]  ;;  %s1018_s7 = sld [smem:[#allocation6 + $0x1a]] }
  0x5f   : > { %v268_v44 = vmul.f32 %v925_v1, %v267_v40  ;;  %v271_v45 = vstv %s957_s27  ;;  %v275_v46 = vstv %s959_s19  ;;  %v283_v47 = vstv %s967_s28  ;;  %s1021_s26 = sld [smem:[#allocation6 + $0x1b]]  ;;  %s1023_s27 = sld [smem:[#allocation6 + $0x27]] }
  0x60   : > { %v285_v48 = vstv %s965_s24  ;;  %v235_v49 = vadd.f32 %v234_v23, %v231_v41  ;;  %v252_v50 = vadd.f32 %v251_v35, %v248_v42  ;;  %v265_v51 = vadd.f32 %v264_v39, %v263_v43  ;;  %s1027_s19 = sld [smem:[#allocation6 + $0x1c]]  ;;  %s1029_s24 = sld [smem:[#allocation6 + $0x1d]] }
  0x61   : > { %v272_v52 = vmul.f32 %v931_v2, %v271_v45  ;;  %v276_v53 = vmul.f32 %v937_v3, %v275_v46  ;;  %v284_v54 = vmul.f32 %v283_v47, %v923_v0  ;;  %v288_v55 = vstv %s972_s8  ;;  %s1037_s28 = sld [smem:[#allocation6 + $0x1e]]  ;;  %s1039_s8 = sld [smem:[#allocation6 + $0x1f]] }
  0x62   : > { %v292_v56 = vstv %s974_s20  ;;  %vm236_vm0 = vcmp.lt.f32.partialorder %v235_v49, %v217_v37  ;;  %v238_v57 = vmin.f32 %v217_v37, %v235_v49  ;;  %v256_v58 = vadd.f32 %v255_v36, %v252_v50  ;;  %s484_s20 = sshll.u32 %s907_s4, 1  ;;  %p1134_p2 = scmp.ne.s32.totalorder %s1126_s21, 0 }
  0x63   : > { %v269_v59 = vadd.f32 %v268_v44, %v265_v51  ;;  %v237_v61 = vsel %vm236_vm0, 1, %v745_v60  ;;  %v286_v62 = vadd.f32 %v285_v48, %v284_v54  ;;  %v289_v63 = vmul.f32 %v925_v1, %v288_v55 }
  0x64   : > { %v293_v4 = vmul.f32 %v931_v2, %v292_v56  ;;  %vm257_vm1 = vcmp.lt.f32.partialorder %v256_v58, %v238_v57  ;;  %v259_v5 = vmin.f32 %v238_v57, %v256_v58  ;;  %v296_v7 = vstv %s984_s17  ;;  %s528_s17 = sshll.u32 %s731_s12, 5  ;;  %s746_s12 = smov [#allocation7]  }
  0x65   : > { %v273_v6 = vadd.f32 %v272_v52, %v269_v59  ;;  %v258_v8 = vsel %vm257_vm1, 2, %v237_v61  ;;  %v290_v9 = vadd.f32 %v289_v63, %v286_v62  ;;  %v297_v10 = vmul.f32 %v937_v3, %v296_v7 }
  0x66   : > { %v304_v11 = vstv %s989_s3  ;;  %v306_v14 = vstv %s993_s18  ;;  %v309_v15 = vstv %s995_s15  ;;  %v313_v18 = vstv %s1001_s16  ;;  %s192_s3 = scalar_lea.vmem [#allocation7], %s484_s20 }
  0x67   : > { %v277_v12 = vadd.f32 %v276_v53, %v273_v6  ;;  %v305_v13 = vmul.f32 %v304_v11, %v923_v0  ;;  %v294_v16 = vadd.f32 %v293_v4, %v290_v9  ;;  %v310_v17 = vmul.f32 %v925_v1, %v309_v15  ;;  %s380_s18 = sshll.u32 %s192_s3, 4  ;;  %s1069_s18 = int_to_ptr.vmem [resolvable:$true] %s380_s18 }
  0x68   : > { %v317_v19 = vstv %s1003_s23  ;;  %v314_v22 = vmul.f32 %v931_v2, %v313_v18  ;;  %v325_v25 = vstv %s1010_s30  ;;  %v327_v28 = vstv %s1012_s5  ;;  %s1067_s23 = scalar_lea.hbm %s1118_s2, %s528_s17  ;;  %s366_s30 = scalar_lea.sflag [#allocation4], %s907_s4 }
  0x69   : > { %vm278_vm2 = vcmp.lt.f32.partialorder %v277_v12, %v259_v5  ;;  %v280_v20 = vmin.f32 %v259_v5, %v277_v12  ;;  %v307_v21 = vadd.f32 %v306_v14, %v305_v13  ;;  %v298_v23 = vadd.f32 %v297_v10, %v294_v16  ;;  %s653_s5 = scalar_lea.vmem %s1069_s18, 32 }
  0x6a   : > { %v318_v24 = vmul.f32 %v937_v3, %v317_v19  ;;  %v326_v27 = vmul.f32 %v325_v25, %v923_v0  ;;  %v330_v29 = vstv %s1014_s6  ;;  %v279_v30 = vsel %vm278_vm2, 3, %v258_v8  ;;  %p654_p12 = scmp.ne.s32.totalorder %s1069_s18, %s653_s5  ;;  %s657_s6 = sshll.u32 %s746_s12, 4  ;;  %s658_s6 = int_to_ptr.vmem [resolvable:$false] %s657_s6 }
  0x6b   : > { %v311_v26 = vadd.f32 %v310_v17, %v307_v21  ;;  %vm299_vm3 = vcmp.lt.f32.partialorder %v298_v23, %v280_v20  ;;  %v331_v31 = vmul.f32 %v925_v1, %v330_v29  ;;  %v334_v32 = vstv %s1018_s7  ;;  %s659_s7 = scalar_lea.vmem %s658_s6, 64  ;;  %p660_p0 = scmp.lt.s32.totalorder %s1069_s18, %s658_s6 }
  0x6c   : > { %v301_v33 = vmin.f32 %v280_v20, %v298_v23  ;;  %v328_v35 = vadd.f32 %v327_v28, %v326_v27  ;;  %v335_v36 = vmul.f32 %v931_v2, %v334_v32  ;;  %v338_v37 = vstv %s1021_s26  ;;  %p655_p13 = pnand %p654_p12, %p1134_p2  ;;  %p661_p1 = scmp.lt.s32.totalorder %s659_s7, %s653_s5 }
  0x6d   : > { %v315_v34 = vadd.f32 %v314_v22, %v311_v26  ;;  %v346_v38 = vstv %s1027_s19  ;;  %v348_v39 = vstv %s1023_s27  ;;  %v351_v40 = vstv %s1029_s24 }
  0x6e   : > { %v332_v42 = vadd.f32 %v331_v31, %v328_v35  ;;  %v339_v43 = vmul.f32 %v937_v3, %v338_v37  ;;  %v347_v44 = vmul.f32 %v346_v38, %v923_v0  ;;  %v300_v45 = vsel %vm299_vm3, 4, %v279_v30  ;;  %p656_p6 = pneg %p655_p13  ;;  %p662_p9 = por %p661_p1, %p660_p0 }
  0x6f   : > { %v319_v41 = vadd.f32 %v318_v24, %v315_v34  ;;  %v352_v46 = vmul.f32 %v925_v1, %v351_v40  ;;  %v355_v47 = vstv %s1037_s28  ;;  %v359_v48 = vstv %s1039_s8 }
  0x70   : > { %v336_v50 = vadd.f32 %v335_v36, %v332_v42  ;;  %v349_v51 = vadd.f32 %v348_v39, %v347_v44  ;;  %v356_v52 = vmul.f32 %v931_v2, %v355_v47  ;;  %v360_v55 = vmul.f32 %v937_v3, %v359_v48  ;;  %p663_p8 = pnand %p662_p9, %p656_p6 }
  0x71   : > { %vm320_vm4 = vcmp.lt.f32.partialorder %v319_v41, %v301_v33  ;;  %v322_v49 = vmin.f32 %v301_v33, %v319_v41 }
  0x72   : > { %v340_v53 = vadd.f32 %v339_v43, %v336_v50  ;;  %v353_v54 = vadd.f32 %v352_v46, %v349_v51  ;;  %v321_v0 = vsel %vm320_vm4, 5, %v300_v45 }
  0x74   : > { %vm341_vm5 = vcmp.lt.f32.partialorder %v340_v53, %v322_v49  ;;  %v343_v56 = vmin.f32 %v322_v49, %v340_v53  ;;  %v357_v57 = vadd.f32 %v356_v52, %v353_v54 }
  0x75   : > { %v342_v1 = vsel %vm341_vm5, 6, %v321_v0 }
  0x76   : > { %v361_v58 = vadd.f32 %v360_v55, %v357_v57 }
  0x78   : > { %vm362_vm6 = vcmp.lt.f32.partialorder %v361_v58, %v343_v56 }
  0x79   : > { %v363_v2 = vsel %vm362_vm6, 7, %v342_v1 }
  0x7a   : > { %364 = vst [vmem:[%s192_s3] sm:$0x3] %v363_v2 }
  0x7b   : > { %666 = shalt.err (!%p663_p8)
}
  0x7c   : > { %s667_s4 = scalar_lea.hbm %s1067_s23, 32  ;;  %s671_s19 = scalar_lea.hbm %s1118_s2, 64 }
  0x7d   : > { %p668_p4 = scmp.ne.s32.totalorder %s1067_s23, %s667_s4  ;;  %p672_p5 = scmp.lt.u32.totalorder %s1067_s23, %s1118_s2 }
  0x7e   : > { %p673_p3 = scmp.lt.u32.totalorder %s671_s19, %s667_s4  ;;  %p675_p12 = scmp.lt.u32.totalorder %s667_s4, %s1067_s23 }
  0x7f   : > { %p669_p10 = pnand %p668_p4, %p1134_p2 }
  0x80   : > { %p674_p7 = por %p673_p3, %p672_p5 }
  0x81   : > { %p670_p11 = pneg %p669_p10 }
  0x82   : > { %p676_p13 = por %p675_p12, %p674_p7 }
  0x84   : > { %p677_p6 = pnand %p676_p13, %p670_p11 }
  0x86   : > { %680 = shalt.err (!%p677_p6)
}
  0x87   : > { %538 = dma.vmem_to_hbm [thread:$0]  (%p1134_p2), %s1069_s18, 32, %s1067_s23, %s366_s30  }
  0x88 PF: > { %s392_s8 = sand.u32 1, %s719_s9   ;;  %p1135_p0 = scmp.ne.s32.totalorder %s1127_s22, 0 }
  0x89   : > { %p1136_p1 = scmp.ge.s32.totalorder %s739_s14, 2  ;;  %s393_s20 = scalar_lea.sflag [#allocation4], %s392_s8 }
  0x8b   : > { %p549_p9 = pnand %p1136_p1, %p1135_p0 }
  0x8d   : > { %714 = dma.done.wait (!%p549_p9), %s393_s20, 32  }
  0x8e   : > { %716 = vsyncadd (!%p549_p9), %s393_s20, 4294967264  ;;  %s19_s14 = sadd.s32 1, %s739_s14   ;;  %s1137_s9 = smov %s723_s10 }
  0x8f   : > { %p16_p8 = scmp.ge.s32.totalorder %s19_s14, 4   ;;  %s1138_s10 = smov %s727_s11 }
  0x90   : > { %s1139_s11 = smov %s872_s25  ;;  %s1140_s12 = smov %s735_s13 }
  0x91   : > { %s1141_s13 = smov %s1143_s29  ;;  %18 = sbr.rel (!%p16_p8) target bundleno = 7 (0x7), region = 81 }
  0x98   :  { %398 = vsyncpa [#allocation3], 1 }
  0x99   :  { %400 = vsyncpa [#allocation3 + $0x1], 1 }
  0x9a   :  { %401 = vsyncpa [#allocation4], 1 }
  0x9b   :  { %403 = vsyncpa [#allocation4 + $0x1], 1 }
  0x9c   :  { %404 = vsyncpa [#allocation5], 1 }
  0x9d   :  { %406 = vsyncpa [#allocation5 + $0x1], 1 }

</bundles_post_ra>
